<compile_context>
chip_gen: v7x
topology: tpu7x:2x2x1
jax: 0.10.0
libtpu: 0.0.40
codegen_flags: <defaults>
</compile_context>

<pallas_src>
import functools

import jax
import jax.numpy as jnp
import numpy as np
from jax import lax
from jax.experimental import pallas as pl
from jax.experimental.pallas import tpu as pltpu

EPS = 1e-5  # BatchNorm2d default eps


def _f1up_kernel(x_ref, scale_ref, shift_ref, w_ref, out_ref, *, H, W):
    """One image per grid step.

    x_ref:     [1, Ci, H*W]   channel-major pixels (lane dim = H*W, dense)
    scale_ref: [Ci, 1]        gamma * rsqrt(var + eps)
    shift_ref: [Ci, 1]        beta - mean * scale
    w_ref:     [4*Co, 4*Ci]   fused sub-pixel ConvTranspose weight
    out_ref:   [1, 4*Co, H*W] packed sub-pixel outputs, row = (dy*2+dx)*Co + co
    """
    HW = H * W
    x = x_ref[0]                                                   # [Ci, HW]

    # BatchNorm2d (folded affine) + ELU(alpha=1), computed once per pixel.
    xn = x * scale_ref[...] + shift_ref[...]
    act = jnp.where(xn > 0, xn, jnp.exp(jnp.minimum(xn, 0.0)) - 1.0)

    # Shifted copies of the *activated* tensor along the flattened pixel dim.
    def shift_pix(a, s):                                           # b[:, p] = a[:, p+s]
        pad = jnp.zeros((a.shape[0], s), a.dtype)
        return jnp.concatenate([a[:, s:], pad], axis=1)

    pix = lax.broadcasted_iota(jnp.int32, (1, HW), 1)
    mask_w = (pix % W) < (W - 1)                                   # ix + 1 in range
    mask_h = pix < (H - 1) * W                                     # iy + 1 in range

    a01 = jnp.where(mask_w, shift_pix(act, 1), 0.0)                # act[iy, ix+1]
    a10 = jnp.where(mask_h, shift_pix(act, W), 0.0)                # act[iy+1, ix]
    a11 = jnp.where(mask_w & mask_h, shift_pix(act, W + 1), 0.0)   # act[iy+1, ix+1]

    # Single fused MXU matmul: [4*Co, 4*Ci] @ [4*Ci, HW] -> [4*Co, HW].
    A = jnp.concatenate([act, a01, a10, a11], axis=0)
    out_ref[0] = jnp.dot(w_ref[...], A,
                         preferred_element_type=jnp.float32,
                         precision=lax.Precision.HIGHEST)


def f1_up_forward(x_nchw, gamma, beta, w_pt):
    """x_nchw: [N, 16, H, W]; w_pt: ConvTranspose2d weight [Cin=16, Cout=8, 3, 3]."""
    N, Ci, H, W = x_nchw.shape
    Co = w_pt.shape[1]
    HW = H * W
    x = x_nchw.astype(jnp.float32)

    # BatchNorm2d training-mode statistics (biased variance) -- tiny XLA reduction.
    gamma = gamma.astype(jnp.float32)
    beta = beta.astype(jnp.float32)
    mean = jnp.mean(x, axis=(0, 2, 3))                             # [Ci]
    var = jnp.mean(jnp.square(x - mean[None, :, None, None]), axis=(0, 2, 3))
    inv = lax.rsqrt(var + EPS)
    scale = (gamma * inv).reshape(Ci, 1)
    shift = (beta - mean * gamma * inv).reshape(Ci, 1)

    # Channel-major pixel layout: NCHW -> [N, Ci, H*W] is a free reshape.
    x2 = x.reshape(N, Ci, HW)

    # Fused sub-pixel weight [4*Co, 4*Ci]; output row block q = dy*2 + dx, K block p
    # indexes the operands [a00, a01, a10, a11]:
    #   out[2iy+0, 2ix+0] = a00 @ W[1,1]
    #   out[2iy+0, 2ix+1] = a00 @ W[1,2] + a01 @ W[1,0]
    #   out[2iy+1, 2ix+0] = a00 @ W[2,1] + a10 @ W[0,1]
    #   out[2iy+1, 2ix+1] = a00 @ W[2,2] + a01 @ W[2,0] + a10 @ W[0,2] + a11 @ W[0,0]
    WT = lambda ky, kx: w_pt[:, :, ky, kx].T.astype(jnp.float32)   # [Co, Ci]
    Z = jnp.zeros((Co, Ci), jnp.float32)
    wfused = jnp.block([
        [WT(1, 1), Z,        Z,        Z       ],                  # q = (0, 0)
        [WT(1, 2), WT(1, 0), Z,        Z       ],                  # q = (0, 1)
        [WT(2, 1), Z,        WT(0, 1), Z       ],                  # q = (1, 0)
        [WT(2, 2), WT(2, 0), WT(0, 2), WT(0, 0)],                  # q = (1, 1)
    ])                                                             # [4*Co, 4*Ci]

    kernel = functools.partial(_f1up_kernel, H=H, W=W)
    packed = pl.pallas_call(
        kernel,
        out_shape=jax.ShapeDtypeStruct((N, 4 * Co, HW), jnp.float32),
        grid=(N,),
        in_specs=[
            pl.BlockSpec((1, Ci, HW), lambda n: (n, 0, 0)),
            pl.BlockSpec((Ci, 1), lambda n: (0, 0)),
            pl.BlockSpec((Ci, 1), lambda n: (0, 0)),
            pl.BlockSpec((4 * Co, 4 * Ci), lambda n: (0, 0)),
        ],
        out_specs=pl.BlockSpec((1, 4 * Co, HW), lambda n: (n, 0, 0)),
        compiler_params=pltpu.CompilerParams(dimension_semantics=("parallel",)),
    )(x2, scale, shift, wfused)

    # Un-pack sub-pixels: [N, (dy,dx,Co), (H,W)] -> [N, Co, 2H, 2W] (single transpose).
    out = packed.reshape(N, 2, 2, Co, H, W)
    out = jnp.transpose(out, (0, 3, 4, 1, 5, 2)).reshape(N, Co, 2 * H, 2 * W)
    return out


def f1_up_reference(x_nchw, gamma, beta, w_pt):
    """Pure-JAX reference (training-mode BN + ELU + ConvTranspose2d semantics)."""
    mean = jnp.mean(x_nchw, axis=(0, 2, 3), keepdims=True)
    var = jnp.mean((x_nchw - mean) ** 2, axis=(0, 2, 3), keepdims=True)
    xn = gamma[None, :, None, None] * (x_nchw - mean) * lax.rsqrt(var + EPS) \
        + beta[None, :, None, None]
    a = jnp.where(xn > 0, xn, jnp.exp(jnp.minimum(xn, 0.0)) - 1.0)
    rhs = jnp.transpose(w_pt[:, :, ::-1, ::-1], (2, 3, 0, 1))      # [kH, kW, Ci, Co]
    dn = lax.conv_dimension_numbers(a.shape, rhs.shape, ('NCHW', 'HWIO', 'NCHW'))
    return lax.conv_general_dilated(
        a, rhs, window_strides=(1, 1), padding=((1, 2), (1, 2)),
        lhs_dilation=(2, 2), rhs_dilation=(1, 1), dimension_numbers=dn,
        precision=jax.lax.Precision.HIGHEST)


if __name__ == "__main__":
    key = jax.random.PRNGKey(0)
    kx, kg, kb, kw = jax.random.split(key, 4)

    N, Ci, H, W, Co = 2, 16, 16, 16, 8
    x_left = jax.random.normal(kx, (N, Ci, H, W), jnp.float32)       # NCHW like PyTorch
    gamma = 1.0 + 0.1 * jax.random.normal(kg, (Ci,), jnp.float32)    # BN weight
    beta = 0.1 * jax.random.normal(kb, (Ci,), jnp.float32)           # BN bias
    w_pt = 0.1 * jax.random.normal(kw, (Ci, Co, 3, 3), jnp.float32)  # ConvT [Cin,Cout,kH,kW]

    out = f1_up_forward(x_left, gamma, beta, w_pt)
    out = jax.block_until_ready(out)
    assert out.shape == (N, Co, 2 * H, 2 * W), out.shape

    ref = f1_up_reference(x_left, gamma, beta, w_pt)
    np.testing.assert_allclose(np.asarray(out), np.asarray(ref), rtol=1e-2, atol=1e-2)

    print("KERNEL_OK")
</pallas_src>

<mosaic_0001>
module attributes {stable_mosaic.version = 11 : i64} {
  func.func @_f1up_kernel(%arg0: i32, %arg1: memref<1x16x256xf32, #tpu.memory_space<vmem>>, %arg2: memref<16x1xf32, #tpu.memory_space<vmem>>, %arg3: memref<16x1xf32, #tpu.memory_space<vmem>>, %arg4: memref<32x64xf32, #tpu.memory_space<vmem>>, %arg5: memref<1x32x256xf32, #tpu.memory_space<vmem>>) attributes {dimension_semantics = [#tpu.dimension_semantics<parallel>], iteration_bounds = array<i64: 2>, scalar_prefetch = 0 : i64, scratch_operands = 0 : i64, tpu.core_type = #tpu.core_type<tc>, window_params = [{transform_indices = @transform_0, window_bounds = array<i64: 1, 16, 256>}, {pipeline_mode = #tpu.pipeline_mode<synchronous>, transform_indices = @transform_1, window_bounds = array<i64: 16, 1>}, {pipeline_mode = #tpu.pipeline_mode<synchronous>, transform_indices = @transform_2, window_bounds = array<i64: 16, 1>}, {pipeline_mode = #tpu.pipeline_mode<synchronous>, transform_indices = @transform_3, window_bounds = array<i64: 32, 64>}, {transform_indices = @transform_4, window_bounds = array<i64: 1, 32, 256>}]} {
    %c0 = arith.constant 0 : index
    %c0_0 = arith.constant 0 : index
    %c0_1 = arith.constant 0 : index
    %0 = vector.load %arg1[%c0, %c0_0, %c0_1] : memref<1x16x256xf32, #tpu.memory_space<vmem>>, vector<1x16x256xf32>
    %1 = vector.shape_cast %0 : vector<1x16x256xf32> to vector<16x256xf32>
    %c0_2 = arith.constant 0 : index
    %c0_3 = arith.constant 0 : index
    %2 = vector.load %arg2[%c0_2, %c0_3] : memref<16x1xf32, #tpu.memory_space<vmem>>, vector<16x1xf32>
    %3 = vector.broadcast %2 : vector<16x1xf32> to vector<16x256xf32>
    %4 = arith.mulf %1, %3 : vector<16x256xf32>
    %c0_4 = arith.constant 0 : index
    %c0_5 = arith.constant 0 : index
    %5 = vector.load %arg3[%c0_4, %c0_5] : memref<16x1xf32, #tpu.memory_space<vmem>>, vector<16x1xf32>
    %6 = vector.broadcast %5 : vector<16x1xf32> to vector<16x256xf32>
    %7 = arith.addf %4, %6 : vector<16x256xf32>
    %cst = arith.constant 0.000000e+00 : f32
    %8 = vector.broadcast %cst : f32 to vector<16x256xf32>
    %9 = arith.cmpf ogt, %7, %8 : vector<16x256xf32>
    %cst_6 = arith.constant 0.000000e+00 : f32
    %10 = vector.broadcast %cst_6 : f32 to vector<16x256xf32>
    %11 = arith.minimumf %7, %10 : vector<16x256xf32>
    %12 = math.exp %11 : vector<16x256xf32>
    %cst_7 = arith.constant 1.000000e+00 : f32
    %13 = vector.broadcast %cst_7 : f32 to vector<16x256xf32>
    %14 = arith.subf %12, %13 : vector<16x256xf32>
    %15 = arith.select %9, %7, %14 : vector<16x256xi1>, vector<16x256xf32>
    %16 = tpu.iota {dimensions = array<i32: 1>} : vector<1x256xi32>
    %c16_i32 = arith.constant 16 : i32
    %c0_i32 = arith.constant 0 : i32
    %17 = arith.cmpi eq, %c16_i32, %c0_i32 : i32
    %c1_i32 = arith.constant 1 : i32
    %18 = arith.select %17, %c1_i32, %c16_i32 : i32
    %19 = vector.broadcast %18 : i32 to vector<1x256xi32>
    %20 = arith.remsi %16, %19 : vector<1x256xi32>
    %c0_i32_8 = arith.constant 0 : i32
    %21 = vector.broadcast %c0_i32_8 : i32 to vector<1x256xi32>
    %22 = arith.cmpi ne, %20, %21 : vector<1x256xi32>
    %c0_i32_9 = arith.constant 0 : i32
    %23 = vector.broadcast %c0_i32_9 : i32 to vector<1x256xi32>
    %24 = arith.cmpi slt, %20, %23 : vector<1x256xi32>
    %c0_i32_10 = arith.constant 0 : i32
    %25 = arith.cmpi slt, %18, %c0_i32_10 : i32
    %26 = vector.broadcast %25 : i1 to vector<1x256xi1>
    %27 = vector.broadcast %26 : vector<1x256xi1> to vector<1x256xi1>
    %28 = arith.xori %24, %27 : vector<1x256xi1>
    %29 = arith.andi %28, %22 : vector<1x256xi1>
    %30 = vector.broadcast %18 : i32 to vector<1x256xi32>
    %31 = arith.addi %20, %30 : vector<1x256xi32>
    %32 = arith.select %29, %31, %20 : vector<1x256xi1>, vector<1x256xi32>
    %c15_i32 = arith.constant 15 : i32
    %33 = vector.broadcast %c15_i32 : i32 to vector<1x256xi32>
    %34 = arith.cmpi slt, %32, %33 : vector<1x256xi32>
    %c240_i32 = arith.constant 240 : i32
    %35 = vector.broadcast %c240_i32 : i32 to vector<1x256xi32>
    %36 = arith.cmpi slt, %16, %35 : vector<1x256xi32>
    %cst_11 = arith.constant 0.000000e+00 : f32
    %37 = vector.broadcast %cst_11 : f32 to vector<16x1xf32>
    %38 = vector.extract_strided_slice %15 {offsets = [0, 1], sizes = [16, 255], strides = [1, 1]} : vector<16x256xf32> to vector<16x255xf32>
    %39 = tpu.concatenate %38, %37 in 1 : vector<16x255xf32>, vector<16x1xf32> -> vector<16x256xf32>
    %cst_12 = arith.constant 0.000000e+00 : f32
    %40 = vector.shape_cast %34 : vector<1x256xi1> to vector<1x256xi1>
    %41 = vector.broadcast %40 : vector<1x256xi1> to vector<16x256xi1>
    %42 = vector.broadcast %cst_12 : f32 to vector<16x256xf32>
    %43 = arith.select %41, %39, %42 : vector<16x256xi1>, vector<16x256xf32>
    %cst_13 = arith.constant 0.000000e+00 : f32
    %44 = vector.broadcast %cst_13 : f32 to vector<16x16xf32>
    %45 = vector.extract_strided_slice %15 {offsets = [0, 16], sizes = [16, 240], strides = [1, 1]} : vector<16x256xf32> to vector<16x240xf32>
    %46 = tpu.concatenate %45, %44 in 1 : vector<16x240xf32>, vector<16x16xf32> -> vector<16x256xf32>
    %cst_14 = arith.constant 0.000000e+00 : f32
    %47 = vector.shape_cast %36 : vector<1x256xi1> to vector<1x256xi1>
    %48 = vector.broadcast %47 : vector<1x256xi1> to vector<16x256xi1>
    %49 = vector.broadcast %cst_14 : f32 to vector<16x256xf32>
    %50 = arith.select %48, %46, %49 : vector<16x256xi1>, vector<16x256xf32>
    %51 = arith.andi %34, %36 : vector<1x256xi1>
    %cst_15 = arith.constant 0.000000e+00 : f32
    %52 = vector.broadcast %cst_15 : f32 to vector<16x17xf32>
    %53 = vector.extract_strided_slice %15 {offsets = [0, 17], sizes = [16, 239], strides = [1, 1]} : vector<16x256xf32> to vector<16x239xf32>
    %54 = tpu.concatenate %53, %52 in 1 : vector<16x239xf32>, vector<16x17xf32> -> vector<16x256xf32>
    %cst_16 = arith.constant 0.000000e+00 : f32
    %55 = vector.shape_cast %51 : vector<1x256xi1> to vector<1x256xi1>
    %56 = vector.broadcast %55 : vector<1x256xi1> to vector<16x256xi1>
    %57 = vector.broadcast %cst_16 : f32 to vector<16x256xf32>
    %58 = arith.select %56, %54, %57 : vector<16x256xi1>, vector<16x256xf32>
    %59 = tpu.concatenate %15, %43, %50, %58 in 0 : vector<16x256xf32>, vector<16x256xf32>, vector<16x256xf32>, vector<16x256xf32> -> vector<64x256xf32>
    %c0_17 = arith.constant 0 : index
    %c0_18 = arith.constant 0 : index
    %60 = vector.load %arg4[%c0_17, %c0_18] : memref<32x64xf32, #tpu.memory_space<vmem>>, vector<32x64xf32>
    %cst_19 = arith.constant dense<0.000000e+00> : vector<32x256xf32>
    %61 = tpu.matmul %60, %59, %cst_19 {dimension_numbers = #tpu.dot_dimension_numbers<[1], [0], [0], [1], [0, 0, 1, 1], [], []>, precision = #tpu.contract_precision<fp32>} : vector<32x64xf32>, vector<64x256xf32>, vector<32x256xf32> -> vector<32x256xf32>
    %c0_20 = arith.constant 0 : index
    %c0_21 = arith.constant 0 : index
    %c0_22 = arith.constant 0 : index
    %62 = vector.load %arg5[%c0_20, %c0_21, %c0_22] : memref<1x32x256xf32, #tpu.memory_space<vmem>>, vector<1x32x256xf32>
    %63 = vector.shape_cast %62 : vector<1x32x256xf32> to vector<32x256xf32>
    %64 = vector.shape_cast %61 : vector<32x256xf32> to vector<1x32x256xf32>
    tpu.vector_store %arg5[%c0_20, %c0_21, %c0_22], %64 {strides = array<i32>} : memref<1x32x256xf32, #tpu.memory_space<vmem>>, vector<1x32x256xf32>,
    return
  }
  func.func @transform_0(%arg0: i32) -> (i32, i32, i32) {
    %c0_i32 = arith.constant 0 : i32
    %c0_i32_0 = arith.constant 0 : i32
    %c0_i32_1 = arith.constant 0 : i32
    return %arg0, %c0_i32, %c0_i32_0 : i32, i32, i32
  }
  func.func @transform_1(%arg0: i32) -> (i32, i32) {
    %c0_i32 = arith.constant 0 : i32
    %c0_i32_0 = arith.constant 0 : i32
    %c0_i32_1 = arith.constant 0 : i32
    return %c0_i32, %c0_i32_0 : i32, i32
  }
  func.func @transform_2(%arg0: i32) -> (i32, i32) {
    %c0_i32 = arith.constant 0 : i32
    %c0_i32_0 = arith.constant 0 : i32
    %c0_i32_1 = arith.constant 0 : i32
    return %c0_i32, %c0_i32_0 : i32, i32
  }
  func.func @transform_3(%arg0: i32) -> (i32, i32) {
    %c0_i32 = arith.constant 0 : i32
    %c0_i32_0 = arith.constant 0 : i32
    %c0_i32_1 = arith.constant 0 : i32
    return %c0_i32, %c0_i32_0 : i32, i32
  }
  func.func @transform_4(%arg0: i32) -> (i32, i32, i32) {
    %c0_i32 = arith.constant 0 : i32
    %c0_i32_0 = arith.constant 0 : i32
    %c0_i32_1 = arith.constant 0 : i32
    return %arg0, %c0_i32, %c0_i32_0 : i32, i32, i32
  }
}

</mosaic_0001>

<bundles_post_ra>
// kernel: tpu_custom_call.1
= control target key start
LH: loop header
LB: loop body
LE: loop exit
PB: predicated region body
PF: predicated region fallthrough
CT: control target
= control target key end

     0   :  { %9 = vsyncpa [#allocation3], 0  ;;  %s2121_s0 = inlined_call_operand.hbm [shape: f32[2,16,256], index: 0, kind: input, shape index: {}]   ;;  %s2122_s1 = inlined_call_operand.vmem [shape: f32[16,1], index: 1, kind: input, shape index: {}]   ;;  %s2123_s2 = inlined_call_operand.vmem [shape: f32[16,1], index: 2, kind: input, shape index: {}]   ;;  %s2124_s3 = inlined_call_operand.vmem [shape: f32[32,64], index: 3, kind: input, shape index: {}]   ;;  %s2125_s4 = inlined_call_operand.hbm [shape: f32[2,32,256], index: 4, kind: output, shape index: {}]  }
   0x1   :  { %11 = vsyncpa [#allocation3 + $0x1], 0 }
   0x2   :  { %12 = vsyncpa [#allocation4], 0 }
   0x3   :  { %14 = vsyncpa [#allocation4 + $0x1], 0  ;;  %s1649_s15 = smov 0   ;;  %s1651_s16 = smov 0  }
   0x4   :  { %s1653_s17 = smov 0   ;;  %s1655_s18 = smov 0  }
   0x5 LB: > { %s1670_s19 = sadd.s32 4294967295, %s1611_s18   ;;  %s1294_s20 = sadd.s32 4294967294, %s1611_s18   ;;  %s1611_s18 = sphi %s1655_s18, %s2152_s18   ;;  %s1607_s17 = sphi %s1653_s17, %s2151_s17   ;;  %s1603_s16 = sphi %s1651_s16, %s2150_s16   ;;  %s1599_s15 = sphi %s1649_s15, %s2149_s15  }
   0x6   : > { %s1674_s21 = sadd.s32 1, %s1611_s18   ;;  %s27_s22 = sadd.s32 1, %s1607_s17 }
   0x7   : > { %s24_s23 = ssub.s32 %s1611_s18, %s1674_s21  ;;  %p34_p0 = scmp.ne.s32.totalorder %s1607_s17, %s1603_s16 }
   0x8   : > { %p25_p1 = scmp.eq.s32.totalorder %s24_s23, 0  ;;  %p35_p2 = scmp.eq.s32.totalorder %s1611_s18, 0 }
   0x9   : > { %p40_p3 = scmp.ne.s32.totalorder %s1603_s16, %s1599_s15  ;;  %p41_p4 = scmp.eq.s32.totalorder %s1670_s19, 0 }
   0xa   : > { %s1686_s24 = scalar_select %p25_p1, %s1607_s17, %s27_s22  }
   0xb   : > { %p1688_p5 = por %p35_p2, %p34_p0  ;;  %p1692_p6 = por %p41_p4, %p40_p3 }
   0xc   : > { %p127_p7 = scmp.eq.s32.totalorder %s1670_s19, 1  ;;  %p133_p8 = scmp.eq.s32.totalorder %s1294_s20, 1 }
   0xd   : > { %p1462_p10 = scmp.lt.s32.totalorder %s1611_s18, 2  ;;  %s162_s29 = sand.u32 1, %s1607_s17  }
   0xe   : > { %p1699_p11 = por %p127_p7, %p34_p0  ;;  %p1703_p12 = por %p133_p8, %p40_p3 }
   0xf   : > { %s1312_s30 = sshll.u32 %s1611_s18, 9  ;;  %s1297_s5 = sshll.u32 %s162_s29, 5 }
  0x10   : > { %s2132_s27 = scalar_select %p1699_p11, 1, 0 }
  0x11   : > { %s2133_s28 = scalar_select %p1703_p12, 1, 0 }
  0x12   : > { %s1712_s8 = scalar_lea.hbm %s2121_s0, %s1312_s30  ;;  %s166_s9 = scalar_lea.vmem [#allocation2], %s1297_s5 }
  0x13   : > { %s173_s10 = sshll.u32 %s166_s9, 4  ;;  %p1716_p13 = pnand %p1462_p10, %p1688_p5  ;;  %s1720_s10 = int_to_ptr.vmem [resolvable:$true] %s173_s10 }
  0x14   : > { %s1722_s12 = scalar_lea.sflag [#allocation3], %s162_s29  ;;  %s1515_s13 = scalar_lea.hbm %s1712_s8, 512 }
  0x15   : > { %p1516_p0 = scmp.ne.s32.totalorder %s1712_s8, %s1515_s13  ;;  %p1517_p1 = pneg %p1716_p13 }
  0x16   : > { %s1520_s22 = scalar_lea.hbm %s2121_s0, 1024  ;;  %p1521_p4 = scmp.lt.u32.totalorder %s1712_s8, %s2121_s0 }
  0x17   : > { %p1518_p2 = pnand %p1517_p1, %p1516_p0  ;;  %p1522_p5 = scmp.lt.u32.totalorder %s1520_s22, %s1515_s13 }
  0x18   : > { %p1524_p8 = scmp.lt.u32.totalorder %s1515_s13, %s1712_s8 }
  0x19   : > { %p1519_p3 = pneg %p1518_p2  ;;  %p1523_p7 = por %p1522_p5, %p1521_p4 }
  0x1b   : > { %p1525_p10 = por %p1524_p8, %p1523_p7 }
  0x1d   : > { %p1526_p9 = pnand %p1525_p10, %p1519_p3 }
  0x1f   : > { %1529 = shalt.err (!%p1526_p9)
}
  0x20   : > { %s1530_s29 = scalar_lea.vmem %s1720_s10, 512  ;;  %s1613_s30 = smov [#allocation2]  }
  0x21   : > { %p1531_p0 = scmp.ne.s32.totalorder %s1720_s10, %s1530_s29  ;;  %s1535_s5 = sshll.u32 %s1613_s30, 4  ;;  %s1536_s5 = int_to_ptr.vmem [resolvable:$false] %s1535_s5 }
  0x22   : > { %s1537_s6 = scalar_lea.vmem %s1536_s5, 1024  ;;  %p1538_p11 = scmp.lt.s32.totalorder %s1720_s10, %s1536_s5 }
  0x23   : > { %p1533_p2 = pnand %p1531_p0, %p1517_p1  ;;  %p1539_p4 = scmp.lt.s32.totalorder %s1537_s6, %s1530_s29 }
  0x25   : > { %p1534_p12 = pneg %p1533_p2  ;;  %p1540_p5 = por %p1539_p4, %p1538_p11 }
  0x27   : > { %p1541_p7 = pnand %p1540_p5, %p1534_p12 }
  0x29   : > { %1544 = shalt.err (!%p1541_p7)
}
  0x2a   : > { %s1614_s7 = smov 256   ;;  %s1615_s9 = smov 16  }
  0x2b   : > { %1457 = dma.hbm_to_vmem [thread:$0]  (!%p1716_p13), %s1712_s8, 512, %s1720_s10, %s1722_s12, %s1614_s7, %s1614_s7, %s1615_s9  }
  0x2c   : > { %p1300_p9 = scmp.ge.s32.totalorder %s1611_s18, 1  ;;  %p181_p1 = scmp.lt.s32.totalorder %s1611_s18, 3 }
  0x2e   : > { %p182_p3 = pnand %p1300_p9, %p181_p1 }
  0x2f   : > { %s1753_s13 = sand.u32 (!%p182_p3), 1, %s1603_s16  }
  0x30   : > { %185 = sbr.rel (%p182_p3) target bundleno = 631 (0x277), region = 36  ;;  %s1301_s14 = sshll.u32 (!%p182_p3), %s1753_s13, 5 }
  0x31   : > { %s188_s20 = scalar_lea.sflag (!%p182_p3), [#allocation3], %s1753_s13  ;;  %s191_s22 = scalar_lea.vmem (!%p182_p3), [#allocation2], %s1301_s14 }
  0x37   : > { %1590 = dma.done.wait (%p1692_p6), %s188_s20, 512  }
  0x38   : > { %1592 = vsyncadd (%p1692_p6), %s188_s20, 4294966784  ;;  %v1616_v0 = vmov 0   ;;  %v236_v1 = vld [vmem:[%s2123_s2] sm:$0xff]  ;;  %v237_v3 = vld [vmem:[%s2123_s2 + $0x8] sm:$0xff]  ;;  %s1617_s30 = smov 127   ;;  %s1618_s5 = smov 112  }
  0x39   : > { %1506 = vset.pattern.permute.xlu1 %v1616_v0  ;;  %1505 = vset.pattern.permute.xlu0 %v1616_v0  ;;  %v220_v2 = vld [vmem:[%s2122_s1] sm:$0xff]  ;;  %v221_v4 = vld [vmem:[%s2122_s1 + $0x8] sm:$0xff]  ;;  %v218_v11 = vld [vmem:[%s191_s22 + $0x10] sm:$0xff]  ;;  %s1619_s6 = smov 111   ;;  %vm319_vm4 = vcmask 1039360   ;;  %vm392_vm6 = vcmask 523264  }
  0x3a   : > { %240 = vperm.xlu1 %1506, %v236_v1   ;;  %224 = vperm.xlu0 %1505, %v220_v2   ;;  %v216_v5 = vld [vmem:[%s191_s22] sm:$0xff]  ;;  %v217_v6 = vld [vmem:[%s191_s22 + $0x8] sm:$0xff]  ;;  %v219_v12 = vld [vmem:[%s191_s22 + $0x18] sm:$0xff]  ;;  %vm344_vm8 = vcmask 916480   ;;  %vm371_vm10 = vcmask 908288   ;;  %s1302_s12 = sshll.u32 %s1753_s13, 6 }
  0x3b   : > { %s215_s23 = scalar_lea.vmem [#allocation5], %s1302_s12  ;;  %s1313_s29 = sshll.u32 %s1670_s19, 10 }
  0x3c   : > { %s1221_s25 = sshll.u32 %s215_s23, 4  ;;  %s1208_s19 = scalar_lea.sflag [#allocation4], %s1753_s13  ;;  %s2072_s25 = int_to_ptr.vmem [resolvable:$true] %s1221_s25 }
  0x3d   : > { %p2146_p11 = scmp.ne.s32.totalorder %s2132_s27, 0  ;;  %s1621_s7 = smov [#allocation5]  }
  0x3e   : > { %245 = vperm.xlu1 %1506, %v237_v3   ;;  %229 = vperm.xlu0 %1505, %v221_v4   ;;  %s1549_s9 = sshll.u32 %s1621_s7, 4  ;;  %s1550_s9 = int_to_ptr.vmem [resolvable:$false] %s1549_s9 }
  0x3f   : > { %s1551_s14 = scalar_lea.vmem %s1550_s9, 2048  ;;  %p1552_p8 = scmp.lt.s32.totalorder %s2072_s25, %s1550_s9 }
  0xb9   : > { %v241_v7 = vpop.permute.xlu1 %240  ;;  %v225_v8 = vpop.permute.xlu0 %224 }
  0xba   : > { %v232_v9 = vmul.f32 %v225_v8, %v216_v5  ;;  %v233_v10 = vmul.f32 %v225_v8, %v217_v6  ;;  %v1620_v5 = vmov 0.0   ;;  %v276_v6 = vlaneseq }
  0xbb   : > { %485 = vmatprep.mubr.f32.mxu1 %v1620_v5  ;;  %912 = vmatprep.mubr.f32.mxu0 %v1620_v5 }
  0xbc   : > { %v248_v13 = vadd.f32 %v241_v7, %v232_v9  ;;  %v249_v14 = vadd.f32 %v241_v7, %v233_v10  ;;  %v277_v7 = vand.u32 127, %v276_v6 }
  0xbd   : > { %v230_v15 = vpop.permute.xlu0 %229  ;;  %v246_v20 = vpop.permute.xlu1 %245 }
  0xbe   : > { %v256_v16 = vmin.f32 %v248_v13, 0.0  ;;  %v257_v17 = vmin.f32 %v249_v14, 0.0  ;;  %v234_v18 = vmul.f32 %v230_v15, %v218_v11  ;;  %v235_v19 = vmul.f32 %v230_v15, %v219_v12  ;;  %v389_v15 = vld [vmem:[%s2124_s3 + $0x8] sm:$0xff] }
  0xbf   : > { %vm252_vm0 = vcmp.gt.f32.partialorder %v248_v13, 0.0  ;;  %vm253_vm1 = vcmp.gt.f32.partialorder %v249_v14, 0.0  ;;  %v278_v8 = vadd.s32 128, %v277_v7  ;;  %v283_v11 = vand.u32 15, %v277_v7 }
  0xc0   : > { %v260_v21 = vmul.f32 1.442695, %v256_v16  ;;  %v262_v22 = vmul.f32 1.442695, %v257_v17  ;;  %v250_v23 = vadd.f32 %v246_v20, %v234_v18  ;;  %v251_v24 = vadd.f32 %v246_v20, %v235_v19 }
  0xc1   : > { %v290_v9 = vand.u32 15, %v278_v8  ;;  %vm1824_vm7 = vcmp.lt.s32.totalorder %v283_v11, 15  ;;  %vm306_vm9 = vcmp.lt.s32.totalorder %v278_v8, 240  ;;  %v391_v8 = vld [vmem:[%s2124_s3 + $0x18] sm:$0xff] }
  0xc2   : > { %1507 = vpow2.f32 %v260_v21  ;;  %v258_v25 = vmin.f32 %v250_v23, 0.0  ;;  %v259_v26 = vmin.f32 %v251_v24, 0.0  ;;  %vm254_vm2 = vcmp.gt.f32.partialorder %v250_v23, 0.0 }
  0xc3   : > { %1509 = vpow2.f32 %v262_v22  ;;  %vm255_vm3 = vcmp.gt.f32.partialorder %v251_v24, 0.0  ;;  %vm1811_vm5 = vcmp.lt.s32.totalorder %v290_v9, 15 }
  0xc4   : > { %v264_v27 = vmul.f32 1.442695, %v258_v25  ;;  %v266_v28 = vmul.f32 1.442695, %v259_v26  ;;  %vm1875_vm11 = vmand %vm1811_vm5, %vm306_vm9 }
  0xc6   : > { %1511 = vpow2.f32 %v264_v27  ;;  %v390_v27 = vld [vmem:[%s2124_s3 + $0x10] sm:$0xff] }
  0xc7   : > { %1513 = vpow2.f32 %v266_v28 }
  0xcc   : > { %v1508_v29 = vpop.eup %1507 }
  0xcd   : > { %v1510_v30 = vpop.eup %1509  ;;  %v1303_v31 = vadd.f32 -1.0, %v1508_v29 }
  0xce   : > { %v1304_v32 = vadd.f32 -1.0, %v1510_v30 }
  0xcf   : > { %v272_v33 = vsel %vm252_vm0, %v248_v13, %v1303_v31 }
  0xd0   : > { %v1512_v34 = vpop.eup %1511  ;;  %v273_v35 = vsel %vm253_vm1, %v249_v14, %v1304_v32  ;;  %v407_v36 = vand.u32 4294901760, %v272_v33  ;;  %v388_v14 = vld [vmem:[%s2124_s3] sm:$0xff] }
  0xd1   : > { %v1514_v37 = vpop.eup %1513  ;;  %313 = vrot.lane.b32.xlu0 %v273_v35, %s1617_s30  ;;  %v1305_v38 = vadd.f32 -1.0, %v1512_v34  ;;  %v405_v39 = vand.u32 4294901760, %v273_v35  ;;  %v394_v22 = vsel %vm392_vm6, %v388_v14, 0 }
  0xd2   : > { %v1306_v40 = vadd.f32 -1.0, %v1514_v37  ;;  %v1773_v41 = vsub.f32 %v272_v33, %v407_v36  ;;  %v1839_v30 = vand.u32 4294901760, %v394_v22  ;;  %v400_v37 = vsel %vm392_vm6, %v390_v27, 0 }
  0xd3   : > { %v274_v42 = vsel %vm254_vm2, %v250_v23, %v1305_v38  ;;  %v1775_v43 = vsub.f32 %v273_v35, %v405_v39  ;;  %v397_v23 = vsel %vm392_vm6, %v389_v15, 0 }
  0xd4   : > { %v275_v44 = vsel %vm255_vm3, %v251_v24, %v1306_v40  ;;  %v411_v45 = vand.u32 4294901760, %v274_v42  ;;  %v538_v46 = vand.u32 4294901760, %v1773_v41  ;;  %v1841_v31 = vand.u32 4294901760, %v397_v23 }
  0xd5   : > { %317 = vrot.lane.b32.xlu1 %v275_v44, %s1617_s30  ;;  %311 = vrot.lane.b32.xlu0 %v272_v33, %s1617_s30  ;;  %v409_v47 = vand.u32 4294901760, %v275_v44  ;;  %v532_v48 = vand.u32 4294901760, %v1775_v43 }
  0xd6   : > { %v1779_v49 = vsub.f32 %v274_v42, %v411_v45  ;;  %v1785_v52 = vpack.c.bf16 %v411_v45, %v407_v36  ;;  %v539_v53 = vsub.f32 %v1773_v41, %v538_v46 }
  0xd7   : > { %v1781_v50 = vpack.c.bf16 %v409_v47, %v405_v39  ;;  %v1783_v51 = vsub.f32 %v275_v44, %v409_v47  ;;  %v533_v56 = vsub.f32 %v1775_v43, %v532_v48 }
  0xd8   : > { %v550_v54 = vand.u32 4294901760, %v1779_v49  ;;  %v540_v63 = vand.u32 4294901760, %v539_v53  ;;  %v1862_v53 = vand.u32 4294901760, %v400_v37 }
  0xd9   : > { %315 = vrot.lane.b32.xlu1 %v274_v42, %s1617_s30  ;;  %1315 = vmatprep.subr.bf16.mxu1 %v1781_v50  ;;  %v544_v57 = vand.u32 4294901760, %v1783_v51  ;;  %v534_v1 = vand.u32 4294901760, %v533_v56 }
  0xda   : > { %1363 = vmatprep.subr.bf16.mxu0 %v1781_v50  ;;  %338 = vrot.lane.b32.xlu0 %v273_v35, %s1618_s5  ;;  %v551_v59 = vsub.f32 %v1779_v49, %v550_v54  ;;  %v1798_v60 = vpack.c.bf16 %v550_v54, %v538_v46  ;;  %v1881_v9 = vsub.f32 %v400_v37, %v1862_v53 }
  0xdb   : > { %1317 = vmatpush1.bf16.msra.mxu1 %v1785_v52  ;;  %1365 = vmatpush1.bf16.msra.mxu0 %v1785_v52  ;;  %v545_v61 = vsub.f32 %v1783_v51, %v544_v57  ;;  %v1803_v62 = vpack.c.bf16 %v544_v57, %v532_v48 }
  0xdc   : > { %v552_v0 = vand.u32 4294901760, %v551_v59 }
  0xdd   : > { %342 = vrot.lane.b32.xlu1 %v275_v44, %s1618_s5  ;;  %v546_v2 = vand.u32 4294901760, %v545_v61 }
  0xde   : > { %336 = vrot.lane.b32.xlu0 %v272_v33, %s1618_s5  ;;  %v1805_v3 = vpack.c.bf16 %v552_v0, %v540_v63 }
  0xdf   : > { %v1807_v4 = vpack.c.bf16 %v546_v2, %v534_v1 }
  0xe1   : > { %340 = vrot.lane.b32.xlu1 %v274_v42, %s1618_s5  ;;  %s2077_s5 = scalar_lea.hbm %s2125_s4, %s1313_s29 }
  0xe2   : > { %365 = vrot.lane.b32.xlu0 %v273_v35, %s1619_s6 }
  0xe5   : > { %369 = vrot.lane.b32.xlu1 %v275_v44, %s1619_s6  ;;  %v1856_v44 = vsub.f32 %v397_v23, %v1841_v31 }
  0xe6   : > { %363 = vrot.lane.b32.xlu0 %v272_v33, %s1619_s6 }
  0xe7   : > { %v2128_v7 = vand.u32 4294901760, %v1856_v44 }
  0xe9   : > { %367 = vrot.lane.b32.xlu1 %v274_v42, %s1619_s6  ;;  %v1853_v42 = vsub.f32 %v394_v22, %v1839_v30  ;;  %v1908_v23 = vsub.f32 %v1856_v44, %v2128_v7  ;;  %s1545_s6 = scalar_lea.vmem %s2072_s25, 1024 }
  0xea   : > { %p1546_p6 = scmp.ne.s32.totalorder %s2072_s25, %s1545_s6  ;;  %p1553_p10 = scmp.lt.s32.totalorder %s1551_s14, %s1545_s6 }
  0xeb   : > { %v488_v63 = vand.u32 4294901760, %v1853_v42 }
  0xec   : > { %p1547_p12 = pnand %p1546_p6, %p2146_p11  ;;  %p1554_p0 = por %p1553_p10, %p1552_p8 }
  0xee   : > { %p1548_p13 = pneg %p1547_p12 }
  0xf0   : > { %p1555_p2 = pnand %p1554_p0, %p1548_p13 }
 0x143   : > { %v314_v10 = vpop.permute.xlu0 %313 }
 0x144   : > { %v326_v13 = vsel %vm319_vm4, %v314_v10, 0.0 }
 0x145   : > { %v333_v16 = vsel %vm1811_vm5, %v326_v13, 0.0 }
 0x146   : > { %v413_v25 = vand.u32 4294901760, %v333_v16 }
 0x147   : > { %v318_v17 = vpop.permute.xlu1 %317  ;;  %v312_v19 = vpop.permute.xlu0 %311 }
 0x148   : > { %v327_v20 = vsel %vm319_vm4, %v318_v17, 0.0  ;;  %v320_v21 = vsel %vm319_vm4, %v312_v19, %v314_v10  ;;  %v1889_v12 = vsub.f32 %v333_v16, %v413_v25 }
 0x149   : > { %v335_v24 = vsel %vm1811_vm5, %v327_v20, 0.0  ;;  %v332_v28 = vsel %vm1824_vm7, %v320_v21, 0.0  ;;  %v1900_v20 = vsub.f32 %v1853_v42, %v488_v63 }
 0x14a   : > { %v417_v26 = vand.u32 4294901760, %v335_v24  ;;  %v415_v38 = vand.u32 4294901760, %v332_v28  ;;  %v556_v37 = vand.u32 4294901760, %v1889_v12 }
 0x14b   : > { %v316_v29 = vpop.permute.xlu1 %315 }
 0x14c   : > { %v321_v32 = vsel %vm319_vm4, %v316_v29, %v318_v17  ;;  %v339_v33 = vpop.permute.xlu0 %338  ;;  %v1844_v34 = vpack.c.bf16 %v417_v26, %v413_v25  ;;  %v1869_v0 = vsub.f32 %v335_v24, %v417_v26  ;;  %v403_v24 = vsel %vm392_vm6, %v391_v8, 0 }
 0x14d   : > { %v334_v35 = vsel %vm1824_vm7, %v321_v32, 0.0  ;;  %v351_v36 = vsel %vm344_vm8, %v339_v33, 0.0  ;;  %v2129_v29 = vand.u32 4294901760, %v1881_v9  ;;  %v1919_v32 = vsub.f32 %v332_v28, %v415_v38 }
 0x14e   : > { %v419_v39 = vand.u32 4294901760, %v334_v35  ;;  %1319 = vmatprep.subr.bf16.mxu1 %v1844_v34  ;;  %1367 = vmatprep.subr.bf16.mxu0 %v1844_v34  ;;  %v358_v45 = vsel %vm306_vm9, %v351_v36, 0.0  ;;  %v568_v25 = vand.u32 4294901760, %v1869_v0 }
 0x14f   : > { %v343_v40 = vpop.permute.xlu1 %342  ;;  %v421_v59 = vand.u32 4294901760, %v358_v45 }
 0x150   : > { %v352_v46 = vsel %vm344_vm8, %v343_v40, 0.0  ;;  %v337_v47 = vpop.permute.xlu0 %336  ;;  %v1860_v48 = vpack.c.bf16 %v419_v39, %v415_v38  ;;  %v1902_v21 = vsub.f32 %v334_v35, %v419_v39 }
 0x151   : > { %v360_v54 = vsel %vm306_vm9, %v352_v46, 0.0  ;;  %v345_v57 = vsel %vm344_vm8, %v337_v47, %v339_v33  ;;  %v1923_v39 = vsub.f32 %v358_v45, %v421_v59  ;;  %v1927_v47 = vand.u32 4294901760, %v403_v24 }
 0x152   : > { %v425_v56 = vand.u32 4294901760, %v360_v54  ;;  %1321 = vmatpush1.bf16.msra.mxu1 %v1860_v48  ;;  %1369 = vmatpush1.bf16.msra.mxu0 %v1860_v48  ;;  %v423_v10 = vand.u32 4294901760, %v345_v57 }
 0x153   : > { %v341_v61 = vpop.permute.xlu1 %340  ;;  %v1951_v18 = vsub.f32 %v403_v24, %v1927_v47 }
 0x154   : > { %v346_v1 = vsel %vm344_vm8, %v341_v61, %v343_v40  ;;  %v366_v6 = vpop.permute.xlu0 %365  ;;  %v1884_v14 = vpack.c.bf16 %v425_v56, %v421_v59  ;;  %v1912_v26 = vsub.f32 %v360_v54, %v425_v56  ;;  %v574_v54 = vand.u32 4294901760, %v1902_v21 }
 0x155   : > { %v427_v11 = vand.u32 4294901760, %v346_v1  ;;  %v378_v13 = vsel %vm371_vm10, %v366_v6, 0.0  ;;  %v569_v59 = vsub.f32 %v1869_v0, %v568_v25 }
 0x156   : > { %v385_v15 = vsel %vm1875_vm11, %v378_v13, 0.0  ;;  %1323 = vmatprep.subr.bf16.mxu1 %v1884_v14  ;;  %1371 = vmatprep.subr.bf16.mxu0 %v1884_v14  ;;  %v2127_v61 = vand.u32 4294901760, %v1912_v26  ;;  %v1942_v13 = vsub.f32 %v345_v57, %v423_v10  ;;  %v575_v57 = vsub.f32 %v1902_v21, %v574_v54 }
 0x157   : > { %v370_v17 = vpop.permute.xlu1 %369  ;;  %v1895_v19 = vpack.c.bf16 %v427_v11, %v423_v10  ;;  %v429_v33 = vand.u32 4294901760, %v385_v15  ;;  %v1930_v56 = vsub.f32 %v346_v1, %v427_v11  ;;  %v580_v11 = vand.u32 4294901760, %v1923_v39 }
 0x158   : > { %v379_v16 = vsel %vm371_vm10, %v370_v17, 0.0  ;;  %v364_v22 = vpop.permute.xlu0 %363  ;;  %v593_v24 = vsub.f32 %v1912_v26, %v2127_v61 }
 0x159   : > { %v387_v27 = vsel %vm1875_vm11, %v379_v16, 0.0  ;;  %1325 = vmatpush1.bf16.msra.mxu1 %v1895_v19  ;;  %1373 = vmatpush1.bf16.msra.mxu0 %v1895_v19  ;;  %v372_v36 = vsel %vm371_vm10, %v364_v22, %v366_v6  ;;  %v562_v6 = vand.u32 4294901760, %v1919_v32  ;;  %v557_v16 = vsub.f32 %v1889_v12, %v556_v37 }
 0x15a   : > { %v433_v35 = vand.u32 4294901760, %v387_v27  ;;  %v384_v40 = vsel %vm1824_vm7, %v372_v36, 0.0  ;;  %v598_v10 = vand.u32 4294901760, %v1930_v56 }
 0x15b   : > { %v368_v46 = vpop.permute.xlu1 %367  ;;  %v431_v8 = vand.u32 4294901760, %v384_v40  ;;  %v563_v36 = vsub.f32 %v1919_v32, %v562_v6 }
 0x15c   : > { %v373_v28 = vsel %vm371_vm10, %v368_v46, %v370_v17  ;;  %v1933_v38 = vpack.c.bf16 %v433_v35, %v429_v33  ;;  %v1936_v2 = vsub.f32 %v387_v27, %v433_v35  ;;  %v1947_v17 = vsub.f32 %v385_v15, %v429_v33 }
 0x15d   : > { %v386_v45 = vsel %vm1824_vm7, %v373_v28, 0.0  ;;  %v490_v15 = vand.u32 4294901760, %v1900_v20  ;;  %v570_v33 = vand.u32 4294901760, %v569_v59  ;;  %v586_v46 = vand.u32 4294901760, %v1942_v13 }
 0x15e   : > { %v435_v1 = vand.u32 4294901760, %v386_v45  ;;  %1327 = vmatprep.subr.bf16.mxu1 %v1933_v38  ;;  %1375 = vmatprep.subr.bf16.mxu0 %v1933_v38  ;;  %v616_v35 = vand.u32 4294901760, %v1936_v2  ;;  %v1968_v28 = vsub.f32 %v384_v40, %v431_v8  ;;  %v558_v20 = vand.u32 4294901760, %v557_v16 }
 0x15f   : > { %v581_v59 = vsub.f32 %v1923_v39, %v580_v11  ;;  %v511_v40 = vsub.f32 %v1881_v9, %v2129_v29  ;;  %v599_v55 = vsub.f32 %v1930_v56, %v598_v10  ;;  %v594_v16 = vand.u32 4294901760, %v593_v24 }
 0x160   : > { %v1957_v22 = vsub.f32 %v386_v45, %v435_v1  ;;  %v1959_v27 = vpack.c.bf16 %v435_v1, %v431_v8  ;;  %v501_v45 = vand.u32 4294901760, %v1908_v23  ;;  %v604_v1 = vand.u32 4294901760, %v1947_v17 }
 0x161   : > { %v576_v8 = vand.u32 4294901760, %v575_v57  ;;  %v521_v23 = vand.u32 4294901760, %v1951_v18  ;;  %v617_v61 = vsub.f32 %v1936_v2, %v616_v35  ;;  %v564_v7 = vand.u32 4294901760, %v563_v36 }
 0x162   : > { %1329 = vmatpush1.bf16.msra.mxu1 %v1959_v27  ;;  %1377 = vmatpush1.bf16.msra.mxu0 %v1959_v27  ;;  %v622_v58 = vand.u32 4294901760, %v1957_v22  ;;  %v587_v57 = vsub.f32 %v1942_v13, %v586_v46  ;;  %v610_v29 = vand.u32 4294901760, %v1968_v28  ;;  %v1384_v36 = vpack.c.bf16 %v574_v54, %v562_v6 }
 0x163   : > { %1331 = vmatprep.subr.bf16.mxu1 %v1807_v4  ;;  %1379 = vmatprep.subr.bf16.mxu0 %v1803_v62  ;;  %v1334_v4 = vpack.c.bf16 %v570_v33, %v558_v20  ;;  %v1382_v62 = vpack.c.bf16 %v568_v25, %v556_v37  ;;  %v605_v25 = vsub.f32 %v1947_v17, %v604_v1  ;;  %v600_v37 = vand.u32 4294901760, %v599_v55 }
 0x164   : > { %v623_v33 = vsub.f32 %v1957_v22, %v622_v58  ;;  %v1336_v24 = vpack.c.bf16 %v576_v8, %v564_v7  ;;  %v2142_v20 = vand.u32 4294901760, %v1912_v26  ;;  %v522_v55 = vsub.f32 %v1951_v18, %v521_v23 }
 0x165   : > { %491 = vmatmul.mubr.f32.vlgmr.msra.gmra.mrb[0].mxu1 %v490_v15  ;;  %916 = vmatmul.mubr.f32.vlgmr.msra.gmra.mrb[0].mxu0 %v488_v63  ;;  %v582_v15 = vand.u32 4294901760, %v581_v59  ;;  %v512_v63 = vand.u32 4294901760, %v511_v40  ;;  %v618_v40 = vand.u32 4294901760, %v617_v61  ;;  %v606_v7 = vand.u32 4294901760, %v605_v25 }
 0x166   : > { %1333 = vmatpush1.bf16.msra.mxu1 %v1805_v3  ;;  %1381 = vmatpush1.bf16.msra.mxu0 %v1798_v60  ;;  %v2141_v60 = vand.u32 4294901760, %v1856_v44  ;;  %v1386_v59 = vpack.c.bf16 %v2142_v20, %v580_v11  ;;  %v624_v54 = vand.u32 4294901760, %v623_v33  ;;  %v2143_v61 = vand.u32 4294901760, %v1881_v9 }
 0x167   : > { %1335 = vmatprep.subr.bf16.mxu1 %v1334_v4  ;;  %1383 = vmatprep.subr.bf16.mxu0 %v1382_v62  ;;  %v1338_v3 = vpack.c.bf16 %v594_v16, %v582_v15  ;;  %v588_v4 = vand.u32 4294901760, %v587_v57  ;;  %v611_v62 = vsub.f32 %v1968_v28, %v610_v29  ;;  %v1342_v11 = vpack.c.bf16 %v618_v40, %v606_v7 }
 0x168   : > { %496 = vmatprep.mubr.f32.mxu1 %v1620_v5  ;;  %921 = vmatprep.mubr.f32.mxu0 %v1620_v5  ;;  %v1390_v8 = vpack.c.bf16 %v616_v35, %v604_v1  ;;  %v523_v16 = vand.u32 4294901760, %v522_v55 }
 0x169   : > { %502 = vmatmul.mubr.f32.gmra.mrb[2].mxu1 %v501_v45  ;;  %925 = vmatmul.mubr.f32.gmra.mrb[2].mxu0 %v2141_v60  ;;  %v1340_v6 = vpack.c.bf16 %v600_v37, %v588_v4  ;;  %v1388_v45 = vpack.c.bf16 %v598_v10, %v586_v46  ;;  %v612_v57 = vand.u32 4294901760, %v611_v62  ;;  %v1392_v10 = vpack.c.bf16 %v622_v58, %v610_v29 }
 0x16a   : > { %1337 = vmatpush1.bf16.msra.mxu1 %v1336_v24  ;;  %1385 = vmatpush1.bf16.msra.mxu0 %v1384_v36  ;;  %v2144_v46 = vpack.c.bf16 %v1783_v51, %v1775_v43  ;;  %v1350_v58 = vpack.c.bf16 %v1869_v0, %v1889_v12  ;;  %v2145_v29 = vpack.c.bf16 %v1779_v49, %v1773_v41 }
 0x16b   : > { %1339 = vmatprep.subr.bf16.mxu1 %v1338_v3  ;;  %1387 = vmatprep.subr.bf16.mxu0 %v1386_v59  ;;  %v1344_v15 = vpack.c.bf16 %v624_v54, %v612_v57  ;;  %v1352_v43 = vpack.c.bf16 %v1902_v21, %v1919_v32  ;;  %v1354_v41 = vpack.c.bf16 %v1912_v26, %v1923_v39 }
 0x16c   : > { %507 = vmatprep.mubr.f32.mxu1 %v1620_v5  ;;  %930 = vmatprep.mubr.f32.mxu0 %v1620_v5  ;;  %v1356_v49 = vpack.c.bf16 %v1930_v56, %v1942_v13  ;;  %v1360_v51 = vpack.c.bf16 %v1957_v22, %v1968_v28 }
 0x16d   : > { %513 = vmatmul.mubr.f32.gmra.mrb[4].mxu1 %v512_v63  ;;  %934 = vmatmul.mubr.f32.gmra.mrb[4].mxu0 %v2143_v61 }
 0x16e   : > { %1341 = vmatpush1.bf16.msra.mxu1 %v1340_v6  ;;  %1389 = vmatpush1.bf16.msra.mxu0 %v1388_v45 }
 0x16f   : > { %1343 = vmatprep.subr.bf16.mxu1 %v1342_v11  ;;  %1391 = vmatprep.subr.bf16.mxu0 %v1390_v8 }
 0x170   : > { %518 = vmatprep.mubr.f32.mxu1 %v1620_v5  ;;  %939 = vmatprep.mubr.f32.mxu0 %v1620_v5 }
 0x171   : > { %524 = vmatmul.mubr.f32.gmra.mrb[6].mxu1 %v523_v16  ;;  %943 = vmatmul.mubr.f32.gmra.mrb[6].mxu0 %v521_v23 }
 0x172   : > { %1345 = vmatpush1.bf16.msra.mxu1 %v1344_v15  ;;  %1393 = vmatpush1.bf16.msra.mxu0 %v1392_v10 }
 0x173   : > { %1347 = vmatprep.subr.bf16.mxu1 %v2144_v46  ;;  %1395 = vmatprep.subr.bf16.mxu0 %v1781_v50  ;;  %v1358_v50 = vpack.c.bf16 %v1936_v2, %v1947_v17 }
 0x174   : > { %674 = vmatprep.mubr.f32.mxu1 %v1620_v5  ;;  %1061 = vmatprep.mubr.f32.mxu0 %v1620_v5 }
 0x175   : > { %676 = vmatmul.mubr.f32.vlgmr.msra.gmra.mrb[0].mxu1 %v1839_v30  ;;  %1063 = vmatmul.mubr.f32.vlgmr.msra.gmra.mrb[0].mxu0 %v1839_v30 }
 0x176   : > { %1349 = vmatpush1.bf16.msra.mxu1 %v2145_v29  ;;  %1397 = vmatpush1.bf16.msra.mxu0 %v1785_v52 }
 0x177   : > { %1351 = vmatprep.subr.bf16.mxu1 %v1350_v58  ;;  %1399 = vmatprep.subr.bf16.mxu0 %v1844_v34 }
 0x178   : > { %681 = vmatprep.mubr.f32.mxu1 %v1620_v5  ;;  %1068 = vmatprep.mubr.f32.mxu0 %v1620_v5 }
 0x179   : > { %683 = vmatmul.mubr.f32.gmra.mrb[2].mxu1 %v1841_v31  ;;  %1070 = vmatmul.mubr.f32.gmra.mrb[2].mxu0 %v1841_v31 }
 0x17a   : > { %1353 = vmatpush1.bf16.msra.mxu1 %v1352_v43  ;;  %1401 = vmatpush1.bf16.msra.mxu0 %v1860_v48 }
 0x17b   : > { %1355 = vmatprep.subr.bf16.mxu1 %v1354_v41  ;;  %1403 = vmatprep.subr.bf16.mxu0 %v1884_v14 }
 0x17c   : > { %688 = vmatprep.mubr.f32.mxu1 %v1620_v5  ;;  %1075 = vmatprep.mubr.f32.mxu0 %v1620_v5 }
 0x17d   : > { %690 = vmatmul.mubr.f32.gmra.mrb[4].mxu1 %v1862_v53  ;;  %1077 = vmatmul.mubr.f32.gmra.mrb[4].mxu0 %v1862_v53 }
 0x17e   : > { %1357 = vmatpush1.bf16.msra.mxu1 %v1356_v49  ;;  %1405 = vmatpush1.bf16.msra.mxu0 %v1895_v19 }
 0x17f   : > { %1359 = vmatprep.subr.bf16.mxu1 %v1358_v50  ;;  %1407 = vmatprep.subr.bf16.mxu0 %v1933_v38 }
 0x180   : > { %695 = vmatprep.mubr.f32.mxu1 %v1620_v5  ;;  %1082 = vmatprep.mubr.f32.mxu0 %v1620_v5 }
 0x181   : > { %697 = vmatmul.mubr.f32.gmra.mrb[6].mxu1 %v1927_v47  ;;  %1084 = vmatmul.mubr.f32.gmra.mrb[6].mxu0 %v1927_v47 }
 0x182   : > { %1361 = vmatpush1.bf16.msra.mxu1 %v1360_v51  ;;  %1409 = vmatpush1.bf16.msra.mxu0 %v1959_v27 }
 0x183   : > { %799 = vmatprep.mubr.f32.mxu1 %v1620_v5  ;;  %1170 = vmatprep.mubr.f32.mxu0 %v1620_v5 }
 0x185   : > { %802 = vmatmul.mubr.f32.vlgmr.msra.gmra.mrb[0].mxu1 %v1853_v42  ;;  %1172 = vmatmul.mubr.f32.vlgmr.msra.gmra.mrb[0].mxu0 %v1839_v30 }
 0x186   : > { %807 = vmatprep.mubr.f32.mxu1 %v1620_v5  ;;  %1177 = vmatprep.mubr.f32.mxu0 %v1620_v5 }
 0x189   : > { %810 = vmatmul.mubr.f32.gmra.mrb[2].mxu1 %v1856_v44  ;;  %1179 = vmatmul.mubr.f32.gmra.mrb[2].mxu0 %v1841_v31 }
 0x18a   : > { %815 = vmatprep.mubr.f32.mxu1 %v1620_v5  ;;  %1184 = vmatprep.mubr.f32.mxu0 %v1620_v5 }
 0x18d   : > { %818 = vmatmul.mubr.f32.gmra.mrb[4].mxu1 %v1881_v9  ;;  %1186 = vmatmul.mubr.f32.gmra.mrb[4].mxu0 %v1862_v53 }
 0x18e   : > { %823 = vmatprep.mubr.f32.mxu1 %v1620_v5  ;;  %1191 = vmatprep.mubr.f32.mxu0 %v1620_v5 }
 0x191   : > { %826 = vmatmul.mubr.f32.gmra.mrb[6].mxu1 %v1951_v18  ;;  %1193 = vmatmul.mubr.f32.gmra.mrb[6].mxu0 %v1927_v47 }
 0x258   : > { %v803_v52 = vpop.f32.mrb[0].mxu1  ;;  %v1173_v30 = vpop.f32.mrb[0].mxu0 }
 0x259   : > { %v1410_v31 = vadd.f32 %v1173_v30, %v803_v52  ;;  %v805_v34 = vpop.f32.mrb[1].mxu1  ;;  %v1175_v42 = vpop.f32.mrb[1].mxu0 }
 0x25a   : > { %v1411_v44 = vadd.f32 %v1175_v42, %v805_v34 }
 0x25b   : > { %1199 = vst [vmem:[%s215_s23] sm:$0xff] %v1410_v31 }
 0x25c   : > { %1200 = vst [vmem:[%s215_s23 + $0x8] sm:$0xff] %v1411_v44  ;;  %v811_v48 = vpop.f32.mrb[2].mxu1  ;;  %v1180_v53 = vpop.f32.mrb[2].mxu0 }
 0x25d   : > { %v1412_v0 = vadd.f32 %v1180_v53, %v811_v48  ;;  %v813_v9 = vpop.f32.mrb[3].mxu1  ;;  %v1182_v5 = vpop.f32.mrb[3].mxu0 }
 0x25e   : > { %v1413_v14 = vadd.f32 %v1182_v5, %v813_v9 }
 0x25f   : > { %1201 = vst [vmem:[%s215_s23 + $0x10] sm:$0xff] %v1412_v0 }
 0x260   : > { %1202 = vst [vmem:[%s215_s23 + $0x18] sm:$0xff] %v1413_v14  ;;  %v819_v12 = vpop.f32.mrb[4].mxu1  ;;  %v1187_v19 = vpop.f32.mrb[4].mxu0 }
 0x261   : > { %v1414_v21 = vadd.f32 %v1187_v19, %v819_v12  ;;  %v821_v26 = vpop.f32.mrb[5].mxu1  ;;  %v1189_v32 = vpop.f32.mrb[5].mxu0 }
 0x262   : > { %v1415_v39 = vadd.f32 %v1189_v32, %v821_v26 }
 0x263   : > { %1203 = vst [vmem:[%s215_s23 + $0x20] sm:$0xff] %v1414_v21 }
 0x264   : > { %1204 = vst [vmem:[%s215_s23 + $0x28] sm:$0xff] %v1415_v39  ;;  %v827_v47 = vpop.f32.mrb[6].mxu1  ;;  %v1194_v56 = vpop.f32.mrb[6].mxu0 }
 0x265   : > { %v1416_v38 = vadd.f32 %v1194_v56, %v827_v47  ;;  %v829_v2 = vpop.f32.mrb[7].mxu1  ;;  %v1196_v13 = vpop.f32.mrb[7].mxu0 }
 0x266   : > { %v1417_v17 = vadd.f32 %v1196_v13, %v829_v2 }
 0x267   : > { %1205 = vst [vmem:[%s215_s23 + $0x30] sm:$0xff] %v1416_v38 }
 0x268   : > { %1206 = vst [vmem:[%s215_s23 + $0x38] sm:$0xff] %v1417_v17 }
 0x269   : > { %1558 = shalt.err (!%p1555_p2)
}
 0x26a   : > { %s1559_s20 = scalar_lea.hbm %s2077_s5, 1024  ;;  %s1563_s10 = scalar_lea.hbm %s2125_s4, 2048 }
 0x26b   : > { %p1560_p4 = scmp.ne.s32.totalorder %s2077_s5, %s1559_s20  ;;  %p1564_p9 = scmp.lt.u32.totalorder %s2077_s5, %s2125_s4 }
 0x26c   : > { %p1565_p1 = scmp.lt.u32.totalorder %s1563_s10, %s1559_s20  ;;  %p1567_p6 = scmp.lt.u32.totalorder %s1559_s20, %s2077_s5 }
 0x26d   : > { %p1561_p5 = pnand %p1560_p4, %p2146_p11 }
 0x26e   : > { %p1566_p3 = por %p1565_p1, %p1564_p9 }
 0x26f   : > { %p1562_p7 = pneg %p1561_p5 }
 0x270   : > { %p1568_p12 = por %p1567_p6, %p1566_p3 }
 0x272   : > { %p1569_p13 = pnand %p1568_p12, %p1562_p7 }
 0x274   : > { %1572 = shalt.err (!%p1569_p13)
}
 0x275   : > { %s1622_s23 = smov 256   ;;  %s1623_s29 = smov 16  }
 0x276   : > { %1452 = dma.vmem_to_hbm [thread:$0]  (%p2146_p11), %s2072_s25, 1024, %s2077_s5, %s1208_s19, %s1622_s23, %s1622_s23, %s1623_s29  }
 0x277 PF: > { %s1236_s26 = sand.u32 1, %s1599_s15   ;;  %p2147_p8 = scmp.ne.s32.totalorder %s2133_s28, 0 }
 0x278   : > { %p2148_p10 = scmp.ge.s32.totalorder %s1611_s18, 2  ;;  %s1237_s30 = scalar_lea.sflag [#allocation4], %s1236_s26 }
 0x27a   : > { %p1459_p0 = pnand %p2148_p10, %p2147_p8 }
 0x27c   : > { %1594 = dma.done.wait (!%p1459_p0), %s1237_s30, 1024  }
 0x27d   : > { %1596 = vsyncadd (!%p1459_p0), %s1237_s30, 4294966272  ;;  %p17_p2 = scmp.ge.s32.totalorder %s1674_s21, 4   ;;  %s2149_s15 = smov %s1603_s16 }
 0x27e   : > { %s2150_s16 = smov %s1607_s17  ;;  %s2151_s17 = smov %s1686_s24 }
 0x27f   : > { %s2152_s18 = smov %s1674_s21  ;;  %19 = sbr.rel (!%p17_p2) target bundleno = 5 (0x5), region = 81 }
 0x286   :  { %1242 = vsyncpa [#allocation3], 1 }
 0x287   :  { %1244 = vsyncpa [#allocation3 + $0x1], 1 }
 0x288   :  { %1245 = vsyncpa [#allocation4], 1 }
 0x289   :  { %1247 = vsyncpa [#allocation4 + $0x1], 1 }

</bundles_post_ra>
